<compile_context>
chip_gen: v7x
topology: tpu7x:2x2x1
jax: 0.10.0
libtpu: 0.0.40
codegen_flags: <defaults>
</compile_context>

<pallas_src>
import numpy as np
import jax
import jax.numpy as jnp
from jax import lax
from jax.experimental import pallas as pl
from jax.experimental.pallas import tpu as pltpu

B = 2                 # batch
H = W = 12            # input spatial size implied by linear_input_size == 4
OUTPUTS = 4           # number of actions
KS = 4                # conv kernel size
C1 = 3                # conv1 output channels
OH1 = OW1 = (H - KS) // 2 + 1          # 5
NP1 = OH1 * OW1                        # 25 conv1 output positions
OH2 = OW2 = OH1 - KS + 1               # 2
NP2 = OH2 * OW2                        # 4 conv2 output positions (= linear_input_size)
CW = C1 * NP1                          # 75 conv1 activation columns
NIN = H * W                            # 144 flattened input features
EPS = 1e-5

# Packed-constant slab layout (rows of a (16, 128) f32 block, one DMA):
CONST_ROWS = 16
CONST_COLS = 128
G1_ROW = 0            # cols 0:CW      -> per-column gamma1
BT1_ROW = 1           # cols 0:CW      -> per-column beta1
G2_ROW = 2            # col 0          -> gamma2 scalar
BT2_ROW = 3           # col 0          -> beta2 scalar
WH_ROW = 4            # rows 4:4+NP2, cols 0:OUTPUTS -> head weight (Wh.T)
BH_ROW = WH_ROW + NP2  # cols 0:OUTPUTS -> head bias


# --------------------------------------------------------------------------
# Pallas kernel: conv1-as-matmul + BN1 + relu + conv2-as-matmul + BN2 + relu
# + head linear, all fused, all 2-D tensors (batch on sublanes, features on
# lanes).
# --------------------------------------------------------------------------
def dqn_kernel(x_ref, w1_ref, pm_ref, w2_ref, cst_ref, out_ref):
    n1 = float(B * NP1)   # elements per channel for BN1 stats (N*H*W)
    n2 = float(B * NP2)   # elements for BN2 stats (single channel)

    # Unpack the constant slab (single VMEM load, static slices of the value).
    cst = cst_ref[...]                                    # (16, 128)
    g1 = cst[G1_ROW:G1_ROW + 1, 0:CW]                     # (1, 75)
    bt1 = cst[BT1_ROW:BT1_ROW + 1, 0:CW]                  # (1, 75)
    g2 = cst[G2_ROW:G2_ROW + 1, 0:1]                      # (1, 1)
    bt2 = cst[BT2_ROW:BT2_ROW + 1, 0:1]                   # (1, 1)
    wht = cst[WH_ROW:WH_ROW + NP2, 0:OUTPUTS]             # (4, outputs)
    bh = cst[BH_ROW:BH_ROW + 1, 0:OUTPUTS]                # (1, outputs)

    # conv1 as a direct matmul on the flat input (im2col folded into the
    # weight): (B, 144) @ (144, 75) -> (B, 75); col = c*25 + oh*5 + ow.
    # conv1 bias is dropped: it cancels in the training-mode BN that follows.
    y1 = jnp.dot(x_ref[...], w1_ref[...],
                 preferred_element_type=jnp.float32)

    # BatchNorm2d(3), training-mode batch stats.  pm_ref is the same-channel
    # indicator (75, 75); one MXU call both reduces [sum; sum_sq] within each
    # channel and broadcasts the results back to every column of the channel.
    s1 = jnp.sum(y1, axis=0, keepdims=True)               # (1, 75)
    ss1 = jnp.sum(y1 * y1, axis=0, keepdims=True)         # (1, 75)
    stats = jnp.concatenate([s1, ss1], axis=0)            # (2, 75)
    red = jnp.dot(stats, pm_ref[...],
                  preferred_element_type=jnp.float32) * (1.0 / n1)
    mean_col = red[0:1, :]                                # (1, 75)
    var_col = red[1:2, :] - mean_col * mean_col           # biased variance
    inv_col = lax.rsqrt(var_col + EPS)
    a1 = jnp.maximum((y1 - mean_col) * inv_col * g1 + bt1, 0.0)   # (B, 75)

    # conv2 as matmul: (B, 75) @ (75, 4) -> (B, 4); col p = oh*2 + ow.
    # conv2 bias dropped (cancelled by BN2 mean subtraction).
    y2 = jnp.dot(a1, w2_ref[...], preferred_element_type=jnp.float32)

    # BatchNorm2d(1): a single channel -> stats over every element of y2.
    m2 = jnp.sum(y2, keepdims=True) * (1.0 / n2)          # (1, 1)
    v2 = jnp.sum(y2 * y2, keepdims=True) * (1.0 / n2) - m2 * m2
    inv2 = lax.rsqrt(v2 + EPS)
    z = jnp.maximum((y2 - m2) * inv2 * g2 + bt2, 0.0)     # (B, 4)

    # flatten is a no-op ((B, 4) already in h*2+w order); head Linear(4, out).
    out_ref[...] = jnp.dot(z, wht,
                           preferred_element_type=jnp.float32) + bh


# --------------------------------------------------------------------------
# Host-side glue (pure numpy, runs ONCE per set of weights -- not per call).
# --------------------------------------------------------------------------
def build_kernel_params(p):
    W1 = np.asarray(p["W1"], np.float32)   # (3, 1, 4, 4)
    W2 = np.asarray(p["W2"], np.float32)   # (1, 3, 4, 4)

    # conv1 with im2col folded in: (144, 75) matmul operand acting directly on
    # x.reshape(B, 144) (NCHW flat, single input channel, stride 2).
    w1d = np.zeros((NIN, CW), np.float32)
    for c in range(C1):
        for oh in range(OH1):
            for ow in range(OW1):
                col = c * NP1 + oh * OW1 + ow
                for kh in range(KS):
                    for kw in range(KS):
                        row = (2 * oh + kh) * W + (2 * ow + kw)
                        w1d[row, col] += W1[c, 0, kh, kw]

    # same-channel indicator matrix for BN1 stats.
    ch = np.arange(CW) // NP1
    pmat = (ch[:, None] == ch[None, :]).astype(np.float32)          # (75, 75)

    # conv2 weights as a (75, 4) selection/weight matrix.
    w2sel = np.zeros((CW, NP2), np.float32)
    for oh in range(OH2):
        for ow in range(OW2):
            pidx = oh * OW2 + ow
            for c in range(C1):
                for kh in range(KS):
                    for kw in range(KS):
                        row = c * NP1 + (oh + kh) * OW1 + (ow + kw)
                        w2sel[row, pidx] += W2[0, c, kh, kw]

    # All remaining tiny constants packed into one lane-dense slab (one DMA).
    cst = np.zeros((CONST_ROWS, CONST_COLS), np.float32)
    cst[G1_ROW, :CW] = np.asarray(p["g1"], np.float32)[ch]
    cst[BT1_ROW, :CW] = np.asarray(p["bt1"], np.float32)[ch]
    cst[G2_ROW, 0] = float(np.asarray(p["g2"])[0])
    cst[BT2_ROW, 0] = float(np.asarray(p["bt2"])[0])
    cst[WH_ROW:WH_ROW + NP2, :OUTPUTS] = np.asarray(p["Wh"], np.float32).T
    cst[BH_ROW, :OUTPUTS] = np.asarray(p["bh"], np.float32)

    return tuple(jnp.asarray(a) for a in (w1d, pmat, w2sel, cst))


def make_dqn_forward(params):
    """Builds the fused forward once: numpy repacking + one jitted pallas_call."""
    w1d, pmat, w2sel, cst = build_kernel_params(params)

    vmem = lambda: pl.BlockSpec(memory_space=pltpu.MemorySpace.VMEM)
    call = pl.pallas_call(
        dqn_kernel,
        out_shape=jax.ShapeDtypeStruct((B, OUTPUTS), jnp.float32),
        in_specs=[vmem() for _ in range(5)],
        out_specs=vmem(),
    )

    @jax.jit
    def forward(x):
        # NCHW (B, 1, 12, 12) -> (B, 144); single reshape, no per-call im2col.
        x2d = x.reshape(B, NIN).astype(jnp.float32)
        return call(x2d, w1d, pmat, w2sel, cst)

    return forward


# --------------------------------------------------------------------------
# Pure-JAX reference (mirrors the PyTorch forward, training-mode BN).
# --------------------------------------------------------------------------
def _bn_train(x, gamma, beta):
    mean = jnp.mean(x, axis=(0, 2, 3), keepdims=True)
    var = jnp.mean((x - mean) ** 2, axis=(0, 2, 3), keepdims=True)
    xn = (x - mean) / jnp.sqrt(var + EPS)
    return xn * gamma[None, :, None, None] + beta[None, :, None, None]


def dqn_forward_reference(x, p):
    dn = ("NCHW", "OIHW", "NCHW")
    prec = lax.Precision.HIGHEST
    y = lax.conv_general_dilated(x, p["W1"], (2, 2), "VALID",
                                 dimension_numbers=dn, precision=prec)
    y = y + p["b1"][None, :, None, None]
    y = jnp.maximum(_bn_train(y, p["g1"], p["bt1"]), 0.0)
    y = lax.conv_general_dilated(y, p["W2"], (1, 1), "VALID",
                                 dimension_numbers=dn, precision=prec)
    y = y + p["b2"][None, :, None, None]
    y = jnp.maximum(_bn_train(y, p["g2"], p["bt2"]), 0.0)
    y = y.reshape(y.shape[0], -1)
    return jnp.dot(y, p["Wh"].T, precision=prec) + p["bh"]


if __name__ == "__main__":
    key = jax.random.PRNGKey(0)
    keys = jax.random.split(key, 11)
    params = {
        "W1": 0.3 * jax.random.normal(keys[0], (C1, 1, KS, KS), jnp.float32),
        "b1": 0.1 * jax.random.normal(keys[1], (C1,), jnp.float32),
        "g1": 1.0 + 0.1 * jax.random.normal(keys[2], (C1,), jnp.float32),
        "bt1": 0.1 * jax.random.normal(keys[3], (C1,), jnp.float32),
        "W2": 0.3 * jax.random.normal(keys[4], (1, C1, KS, KS), jnp.float32),
        "b2": 0.1 * jax.random.normal(keys[5], (1,), jnp.float32),
        "g2": 1.0 + 0.1 * jax.random.normal(keys[6], (1,), jnp.float32),
        "bt2": 0.1 * jax.random.normal(keys[7], (1,), jnp.float32),
        "Wh": 0.4 * jax.random.normal(keys[8], (OUTPUTS, NP2), jnp.float32),
        "bh": 0.1 * jax.random.normal(keys[9], (OUTPUTS,), jnp.float32),
    }
    x = jax.random.normal(keys[10], (B, 1, H, W), jnp.float32)   # NCHW

    forward = make_dqn_forward(params)        # host glue runs once, then jit
    out = jax.block_until_ready(forward(x))
    ref = dqn_forward_reference(x, params)
    np.testing.assert_allclose(np.asarray(out), np.asarray(ref),
                               rtol=2e-2, atol=2e-2)
    print("KERNEL_OK")
</pallas_src>

<mosaic_0001>
module attributes {stable_mosaic.version = 11 : i64} {
  func.func @dqn_kernel(%arg0: memref<2x144xf32, #tpu.memory_space<vmem>>, %arg1: memref<144x75xf32, #tpu.memory_space<vmem>>, %arg2: memref<75x75xf32, #tpu.memory_space<vmem>>, %arg3: memref<75x4xf32, #tpu.memory_space<vmem>>, %arg4: memref<16x128xf32, #tpu.memory_space<vmem>>, %arg5: memref<2x4xf32, #tpu.memory_space<vmem>>) attributes {dimension_semantics = [], scalar_prefetch = 0 : i64, scratch_operands = 0 : i64, tpu.core_type = #tpu.core_type<tc>} {
    %c0 = arith.constant 0 : index
    %c0_0 = arith.constant 0 : index
    %0 = vector.load %arg4[%c0, %c0_0] : memref<16x128xf32, #tpu.memory_space<vmem>>, vector<16x128xf32>
    %1 = vector.extract_strided_slice %0 {offsets = [0, 0], sizes = [1, 75], strides = [1, 1]} : vector<16x128xf32> to vector<1x75xf32>
    %2 = vector.extract_strided_slice %0 {offsets = [1, 0], sizes = [1, 75], strides = [1, 1]} : vector<16x128xf32> to vector<1x75xf32>
    %3 = vector.extract_strided_slice %0 {offsets = [2, 0], sizes = [1, 1], strides = [1, 1]} : vector<16x128xf32> to vector<1x1xf32>
    %4 = vector.extract_strided_slice %0 {offsets = [3, 0], sizes = [1, 1], strides = [1, 1]} : vector<16x128xf32> to vector<1x1xf32>
    %5 = vector.extract_strided_slice %0 {offsets = [4, 0], sizes = [4, 4], strides = [1, 1]} : vector<16x128xf32> to vector<4x4xf32>
    %6 = vector.extract_strided_slice %0 {offsets = [8, 0], sizes = [1, 4], strides = [1, 1]} : vector<16x128xf32> to vector<1x4xf32>
    %c0_1 = arith.constant 0 : index
    %c0_2 = arith.constant 0 : index
    %7 = vector.load %arg0[%c0_1, %c0_2] : memref<2x144xf32, #tpu.memory_space<vmem>>, vector<2x144xf32>
    %c0_3 = arith.constant 0 : index
    %c0_4 = arith.constant 0 : index
    %8 = vector.load %arg1[%c0_3, %c0_4] : memref<144x75xf32, #tpu.memory_space<vmem>>, vector<144x75xf32>
    %cst = arith.constant dense<0.000000e+00> : vector<2x75xf32>
    %9 = tpu.matmul %7, %8, %cst {dimension_numbers = #tpu.dot_dimension_numbers<[1], [0], [0], [1], [0, 0, 1, 1], [], []>} : vector<2x144xf32>, vector<144x75xf32>, vector<2x75xf32> -> vector<2x75xf32>
    %cst_5 = arith.constant dense<0.000000e+00> : vector<75xf32>
    %10 = vector.multi_reduction <add>, %9, %cst_5 [0] : vector<2x75xf32> to vector<75xf32>
    %11 = vector.shape_cast %10 : vector<75xf32> to vector<1x75xf32>
    %12 = arith.mulf %9, %9 : vector<2x75xf32>
    %cst_6 = arith.constant dense<0.000000e+00> : vector<75xf32>
    %13 = vector.multi_reduction <add>, %12, %cst_6 [0] : vector<2x75xf32> to vector<75xf32>
    %14 = vector.shape_cast %13 : vector<75xf32> to vector<1x75xf32>
    %15 = tpu.concatenate %11, %14 in 0 : vector<1x75xf32>, vector<1x75xf32> -> vector<2x75xf32>
    %c0_7 = arith.constant 0 : index
    %c0_8 = arith.constant 0 : index
    %16 = vector.load %arg2[%c0_7, %c0_8] : memref<75x75xf32, #tpu.memory_space<vmem>>, vector<75x75xf32>
    %cst_9 = arith.constant dense<0.000000e+00> : vector<2x75xf32>
    %17 = tpu.matmul %15, %16, %cst_9 {dimension_numbers = #tpu.dot_dimension_numbers<[1], [0], [0], [1], [0, 0, 1, 1], [], []>} : vector<2x75xf32>, vector<75x75xf32>, vector<2x75xf32> -> vector<2x75xf32>
    %cst_10 = arith.constant 2.000000e-02 : f32
    %18 = vector.broadcast %cst_10 : f32 to vector<2x75xf32>
    %19 = arith.mulf %17, %18 : vector<2x75xf32>
    %20 = vector.extract_strided_slice %19 {offsets = [0, 0], sizes = [1, 75], strides = [1, 1]} : vector<2x75xf32> to vector<1x75xf32>
    %21 = vector.extract_strided_slice %19 {offsets = [1, 0], sizes = [1, 75], strides = [1, 1]} : vector<2x75xf32> to vector<1x75xf32>
    %22 = arith.mulf %20, %20 : vector<1x75xf32>
    %23 = arith.subf %21, %22 : vector<1x75xf32>
    %cst_11 = arith.constant 9.99999974E-6 : f32
    %24 = vector.broadcast %cst_11 : f32 to vector<1x75xf32>
    %25 = arith.addf %23, %24 : vector<1x75xf32>
    %26 = math.rsqrt %25 : vector<1x75xf32>
    %27 = vector.broadcast %20 : vector<1x75xf32> to vector<2x75xf32>
    %28 = arith.subf %9, %27 : vector<2x75xf32>
    %29 = vector.broadcast %26 : vector<1x75xf32> to vector<2x75xf32>
    %30 = arith.mulf %28, %29 : vector<2x75xf32>
    %31 = vector.broadcast %1 : vector<1x75xf32> to vector<2x75xf32>
    %32 = arith.mulf %30, %31 : vector<2x75xf32>
    %33 = vector.broadcast %2 : vector<1x75xf32> to vector<2x75xf32>
    %34 = arith.addf %32, %33 : vector<2x75xf32>
    %cst_12 = arith.constant 0.000000e+00 : f32
    %35 = vector.broadcast %cst_12 : f32 to vector<2x75xf32>
    %36 = arith.maximumf %34, %35 : vector<2x75xf32>
    %c0_13 = arith.constant 0 : index
    %c0_14 = arith.constant 0 : index
    %37 = vector.load %arg3[%c0_13, %c0_14] : memref<75x4xf32, #tpu.memory_space<vmem>>, vector<75x4xf32>
    %cst_15 = arith.constant dense<0.000000e+00> : vector<2x4xf32>
    %38 = tpu.matmul %36, %37, %cst_15 {dimension_numbers = #tpu.dot_dimension_numbers<[1], [0], [0], [1], [0, 0, 1, 1], [], []>} : vector<2x75xf32>, vector<75x4xf32>, vector<2x4xf32> -> vector<2x4xf32>
    %39 = vector.shape_cast %38 : vector<2x4xf32> to vector<1x2x4xf32>
    %cst_16 = arith.constant dense<0.000000e+00> : vector<1xf32>
    %40 = vector.multi_reduction <add>, %39, %cst_16 [1, 2] : vector<1x2x4xf32> to vector<1xf32>
    %41 = vector.shape_cast %40 : vector<1xf32> to vector<1x1x1xf32>
    %42 = vector.extract %41[0, 0, 0] : f32 from vector<1x1x1xf32>
    %43 = vector.broadcast %42 : f32 to vector<1x1xf32>
    %cst_17 = arith.constant 1.250000e-01 : f32
    %44 = vector.broadcast %cst_17 : f32 to vector<1x1xf32>
    %45 = arith.mulf %43, %44 : vector<1x1xf32>
    %46 = arith.mulf %38, %38 : vector<2x4xf32>
    %47 = vector.shape_cast %46 : vector<2x4xf32> to vector<1x2x4xf32>
    %cst_18 = arith.constant dense<0.000000e+00> : vector<1xf32>
    %48 = vector.multi_reduction <add>, %47, %cst_18 [1, 2] : vector<1x2x4xf32> to vector<1xf32>
    %49 = vector.shape_cast %48 : vector<1xf32> to vector<1x1x1xf32>
    %50 = vector.extract %49[0, 0, 0] : f32 from vector<1x1x1xf32>
    %51 = vector.broadcast %50 : f32 to vector<1x1xf32>
    %cst_19 = arith.constant 1.250000e-01 : f32
    %52 = vector.broadcast %cst_19 : f32 to vector<1x1xf32>
    %53 = arith.mulf %51, %52 : vector<1x1xf32>
    %54 = arith.mulf %45, %45 : vector<1x1xf32>
    %55 = arith.subf %53, %54 : vector<1x1xf32>
    %cst_20 = arith.constant 9.99999974E-6 : f32
    %56 = vector.broadcast %cst_20 : f32 to vector<1x1xf32>
    %57 = arith.addf %55, %56 : vector<1x1xf32>
    %58 = math.rsqrt %57 : vector<1x1xf32>
    %59 = vector.broadcast %45 : vector<1x1xf32> to vector<2x4xf32>
    %60 = arith.subf %38, %59 : vector<2x4xf32>
    %61 = vector.broadcast %58 : vector<1x1xf32> to vector<2x4xf32>
    %62 = arith.mulf %60, %61 : vector<2x4xf32>
    %63 = vector.broadcast %3 : vector<1x1xf32> to vector<2x4xf32>
    %64 = arith.mulf %62, %63 : vector<2x4xf32>
    %65 = vector.broadcast %4 : vector<1x1xf32> to vector<2x4xf32>
    %66 = arith.addf %64, %65 : vector<2x4xf32>
    %cst_21 = arith.constant 0.000000e+00 : f32
    %67 = vector.broadcast %cst_21 : f32 to vector<2x4xf32>
    %68 = arith.maximumf %66, %67 : vector<2x4xf32>
    %cst_22 = arith.constant dense<0.000000e+00> : vector<2x4xf32>
    %69 = tpu.matmul %68, %5, %cst_22 {dimension_numbers = #tpu.dot_dimension_numbers<[1], [0], [0], [1], [0, 0, 1, 1], [], []>} : vector<2x4xf32>, vector<4x4xf32>, vector<2x4xf32> -> vector<2x4xf32>
    %70 = vector.broadcast %6 : vector<1x4xf32> to vector<2x4xf32>
    %71 = arith.addf %69, %70 : vector<2x4xf32>
    %c0_23 = arith.constant 0 : index
    %c0_24 = arith.constant 0 : index
    %72 = vector.load %arg5[%c0_23, %c0_24] : memref<2x4xf32, #tpu.memory_space<vmem>>, vector<2x4xf32>
    tpu.vector_store %arg5[%c0_23, %c0_24], %71 {strides = array<i32>} : memref<2x4xf32, #tpu.memory_space<vmem>>, vector<2x4xf32>,
    return
  }
}

</mosaic_0001>

<bundles_post_ra>
// kernel: forward.1
= control target key start
LH: loop header
LB: loop body
LE: loop exit
PB: predicated region body
PF: predicated region fallthrough
CT: control target
= control target key end

     0   :  { %10 = vsyncpa [#allocation3], 0  ;;  %s906_s0 = inlined_call_operand.vmem [shape: f32[2,144], index: 0, kind: input, shape index: {}]   ;;  %s907_s1 = inlined_call_operand.hbm [shape: f32[144,75], index: 1, kind: input, shape index: {}]   ;;  %s908_s2 = inlined_call_operand.hbm [shape: f32[75,75], index: 2, kind: input, shape index: {}]   ;;  %s909_s3 = inlined_call_operand.vmem [shape: f32[75,4], index: 3, kind: input, shape index: {}]   ;;  %s910_s4 = inlined_call_operand.vmem [shape: f32[16,128], index: 4, kind: input, shape index: {}]   ;;  %s911_s5 = inlined_call_operand.hbm [shape: f32[2,4], index: 5, kind: output, shape index: {}]  }
   0x1   :  { %11 = vsyncpa [#allocation6], 0 }
   0x2   :  { %12 = vsyncpa [#allocation4], 0  ;;  %s752_s18 = smov [#allocation2]   ;;  %s680_s22 = scalar_lea.hbm %s907_s1, 2304 }
   0x3   :  { %s20_s19 = sshll.u32 %s752_s18, 4  ;;  %p681_p0 = scmp.ne.s32.totalorder %s907_s1, %s680_s22  ;;  %s21_s19 = int_to_ptr.vmem [resolvable:$true] %s20_s19 }
   0x4   :  { %p684_p1 = scmp.lt.u32.totalorder %s680_s22, %s907_s1 }
   0x6   :  { %p686_p2 = pnand %p684_p1, %p681_p0 }
   0x8   :  { %689 = shalt.err (!%p686_p2)
}
   0x9   :  { %s690_s27 = scalar_lea.vmem %s21_s19, 2304  ;;  %p695_p4 = scmp.lt.s32.totalorder %s21_s19, %s21_s19 }
   0xa   :  { %p691_p3 = scmp.ne.s32.totalorder %s21_s19, %s690_s27  ;;  %p696_p5 = scmp.lt.s32.totalorder %s690_s27, %s690_s27 }
   0xc   :  { %p697_p6 = por %p696_p5, %p695_p4 }
   0xe   :  { %p698_p7 = pnand %p697_p6, %p691_p3 }
  0x10   :  { %701 = shalt.err (!%p698_p7)
}
  0x11   :  { %s753_s28 = smov 128   ;;  %s754_s29 = smov 8  }
  0x12   :  { %26 = dma.hbm_to_vmem [thread:$0]  %s907_s1, 2304, %s21_s19, [#allocation3], %s753_s28, %s753_s28, %s754_s29  }
  0x13   :  { %s755_s7 = smov [#allocation5]   ;;  %s702_s11 = scalar_lea.hbm %s908_s2, 1280 }
  0x14   :  { %s32_s8 = sshll.u32 %s755_s7, 4  ;;  %p703_p8 = scmp.ne.s32.totalorder %s908_s2, %s702_s11  ;;  %s33_s8 = int_to_ptr.vmem [resolvable:$true] %s32_s8 }
  0x15   :  { %p706_p9 = scmp.lt.u32.totalorder %s702_s11, %s908_s2 }
  0x17   :  { %p708_p10 = pnand %p706_p9, %p703_p8 }
  0x19   :  { %711 = shalt.err (!%p708_p10)
}
  0x1a   :  { %s712_s16 = scalar_lea.vmem %s33_s8, 1280  ;;  %p717_p12 = scmp.lt.s32.totalorder %s33_s8, %s33_s8 }
  0x1b   :  { %p713_p11 = scmp.ne.s32.totalorder %s33_s8, %s712_s16  ;;  %p718_p13 = scmp.lt.s32.totalorder %s712_s16, %s712_s16 }
  0x1d   :  { %p719_p0 = por %p718_p13, %p717_p12 }
  0x1f   :  { %p720_p1 = pnand %p719_p0, %p713_p11 }
  0x21   :  { %723 = shalt.err (!%p720_p1)
}
  0x22   :  { %38 = dma.hbm_to_vmem [thread:$0]  %s908_s2, 1280, %s33_s8, [#allocation6], %s753_s28, %s753_s28, %s754_s29  }
  0x23   :  { %746 = dma.done.wait [#allocation3], 2304  }
  0x24   :  { %747 = vsyncadd [#allocation3], 4294964992 }
  0x25   :  { %748 = dma.done.wait [#allocation6], 1280  }
  0x26   :  { %749 = vsyncadd [#allocation6], 4294966016  ;;  %v756_v0 = vmov 0.0|0.0   ;;  %v52_v1 = vld [vmem:[#allocation2] sm:$0xff]  ;;  %v53_v2 = vld [vmem:[#allocation2 + $0x8] sm:$0xff]  ;;  %vm80_vm0 = vcmask 130048  }
  0x27   :  { %600 = vmatprep.subr.bf16.mxu0 %v756_v0  ;;  %627 = vmatprep.subr.bf16.mxu1 %v756_v0  ;;  %v54_v3 = vld [vmem:[#allocation2 + $0x10] sm:$0xff]  ;;  %v601_v4 = vpack.c.bf16 %v53_v2, %v52_v1  ;;  %v55_v5 = vld [vmem:[#allocation2 + $0x18] sm:$0xff]  ;;  %v56_v7 = vld [vmem:[#allocation2 + $0x20] sm:$0xff]  ;;  %vm185_vm1 = vcmask 1042432   ;;  %vm757_vm2 = vmmov 1   ;;  %vm758_vm4 = vmmov 0  }
  0x28   :  { %v604_v6 = vpack.c.bf16 %v55_v5, %v54_v3  ;;  %v57_v8 = vld [vmem:[#allocation2 + $0x28] sm:$0xff]  ;;  %v517_v9 = vld.sshfl [vmem:[%s906_s0] sm:$0x33 pattern:$0x76325410]  ;;  %v172_v11 = vld [vmem:[#allocation5 + $0x8] sm:$0xff] }
  0x29   :  { %602 = vmatpush1.bf16.msra.mxu0 %v601_v4  ;;  %v171_v10 = vld [vmem:[#allocation5] sm:$0xff]  ;;  %v607_v12 = vpack.c.bf16 %v57_v8, %v56_v7  ;;  %v78_v13 = vcombine.high %v517_v9, %v517_v9  ;;  %v59_v16 = vld [vmem:[#allocation2 + $0x38] sm:$0xff]  ;;  %v60_v18 = vld [vmem:[#allocation2 + $0x40] sm:$0xff]  ;;  %v759_v46 = vmov 0.0   ;;  %vm153_vm5 = vcmask 607232   ;;  %s760_s18 = smov [#allocation7]  }
  0x2a   :  { %603 = vmatprep.subr.bf16.mxu0 %v756_v0  ;;  %v628_v14 = vpack.c.bf16 %v172_v11, %v171_v10  ;;  %v58_v15 = vld [vmem:[#allocation2 + $0x30] sm:$0xff]  ;;  %v61_v19 = vld [vmem:[#allocation2 + $0x48] sm:$0xff]  ;;  %v63_v22 = vld [vmem:[#allocation2 + $0x58] sm:$0xff]  ;;  %569 = vmatprep.mubr.msk.f32.mxu1 %vm758_vm4, %v759_v46  ;;  %vm169_vm6 = vcmask 1040384   ;;  %vm181_vm7 = vcmask 613376   ;;  %vm374_vm8 = vcmask 25600  }
  0x2b   :  { %518 = vmatprep.mubr.msk.f32.mxu0 %vm80_vm0, %v78_v13  ;;  %v610_v17 = vpack.c.bf16 %v59_v16, %v58_v15  ;;  %v613_v20 = vpack.c.bf16 %v61_v19, %v60_v18  ;;  %v62_v21 = vld [vmem:[#allocation2 + $0x50] sm:$0xff]  ;;  %v64_v24 = vld [vmem:[#allocation2 + $0x60] sm:$0xff]  ;;  %v65_v25 = vld [vmem:[#allocation2 + $0x68] sm:$0xff]  ;;  %vm427_vm9 = vcmask 1043456   ;;  %vm423_vm10 = vcmask 31744   ;;  %s507_s0 = sshll.u32 %s760_s18, 4  ;;  %s508_s0 = int_to_ptr.vmem [resolvable:$true] %s507_s0 }
  0x2c   :  { %629 = vmatpush3.bf16.msra.mxu1 %v628_v14  ;;  %v616_v23 = vpack.c.bf16 %v63_v22, %v62_v21  ;;  %v619_v26 = vpack.c.bf16 %v65_v25, %v64_v24  ;;  %v66_v27 = vld [vmem:[#allocation2 + $0x70] sm:$0xff]  ;;  %v67_v28 = vld [vmem:[#allocation2 + $0x78] sm:$0xff]  ;;  %v68_v30 = vld [vmem:[#allocation2 + $0x80] sm:$0xff]  ;;  %s724_s19 = scalar_lea.vmem %s508_s0, 32  ;;  %p729_p3 = scmp.lt.s32.totalorder %s508_s0, %s508_s0 }
  0x2d   :  { %605 = vmatpush1.bf16.msra.mxu0 %v604_v6  ;;  %630 = vmatprep.subr.bf16.mxu1 %v756_v0  ;;  %v622_v29 = vpack.c.bf16 %v67_v28, %v66_v27  ;;  %v69_v31 = vld [vmem:[#allocation2 + $0x88] sm:$0xff]  ;;  %v173_v33 = vld [vmem:[#allocation5 + $0x10] sm:$0xff]  ;;  %v175_v36 = vld [vmem:[#allocation5 + $0x20] sm:$0xff]  ;;  %p725_p2 = scmp.ne.s32.totalorder %s508_s0, %s724_s19  ;;  %p730_p4 = scmp.lt.s32.totalorder %s724_s19, %s724_s19 }
  0x2e   :  { %606 = vmatprep.subr.bf16.mxu0 %v756_v0  ;;  %v625_v32 = vpack.c.bf16 %v69_v31, %v68_v30  ;;  %v174_v34 = vld [vmem:[#allocation5 + $0x18] sm:$0xff]  ;;  %v176_v37 = vld [vmem:[#allocation5 + $0x28] sm:$0xff]  ;;  %v177_v39 = vld [vmem:[#allocation5 + $0x30] sm:$0xff] }
  0x2f   :  { %v631_v35 = vpack.c.bf16 %v174_v34, %v173_v33  ;;  %v634_v38 = vpack.c.bf16 %v176_v37, %v175_v36  ;;  %v178_v40 = vld [vmem:[#allocation5 + $0x38] sm:$0xff]  ;;  %v179_v42 = vld [vmem:[#allocation5 + $0x40] sm:$0xff]  ;;  %v180_v43 = vld [vmem:[#allocation5 + $0x48] sm:$0x7]  ;;  %p731_p5 = por %p730_p4, %p729_p3 }
  0x30   :  { %v637_v41 = vpack.c.bf16 %v178_v40, %v177_v39  ;;  %v640_v44 = vpack.c.bf16 %v180_v43, %v179_v42  ;;  %vm832_vm3 = vmpackc.low %vm185_vm1, %vm757_vm2  ;;  %v288_v2 = vld [vmem:[%s909_s3] sm:$0xff]  ;;  %v289_v3 = vld [vmem:[%s909_s3 + $0x8] sm:$0xff] }
  0x31   :  { %608 = vmatpush1.bf16.msra.mxu0 %v607_v12  ;;  %632 = vmatpush3.bf16.msra.mxu1 %v631_v35  ;;  %v644_v4 = vpack.c.bf16 %v289_v3, %v288_v2  ;;  %v290_v5 = vld [vmem:[%s909_s3 + $0x10] sm:$0xff]  ;;  %v291_v6 = vld [vmem:[%s909_s3 + $0x18] sm:$0xff]  ;;  %v292_v8 = vld [vmem:[%s909_s3 + $0x20] sm:$0xff]  ;;  %p732_p6 = pnand %p731_p5, %p725_p2 }
  0x32   :  { %609 = vmatprep.subr.bf16.mxu0 %v756_v0  ;;  %633 = vmatprep.subr.bf16.mxu1 %v756_v0  ;;  %v647_v7 = vpack.c.bf16 %v291_v6, %v290_v5  ;;  %v294_v11 = vld [vmem:[%s909_s3 + $0x30] sm:$0xff]  ;;  %v295_v12 = vld [vmem:[%s909_s3 + $0x38] sm:$0xff]  ;;  %v296_v14 = vld [vmem:[%s909_s3 + $0x40] sm:$0xff] }
  0x33   :  { %v653_v13 = vpack.c.bf16 %v295_v12, %v294_v11  ;;  %v297_v15 = vld [vmem:[%s909_s3 + $0x48] sm:$0x7] }
  0x34   :  { %v656_v16 = vpack.c.bf16 %v297_v15, %v296_v14  ;;  %v50_v12 = vld [vmem:[%s910_s4 + $0x8] sm:$0xff] }
  0x35   :  { %611 = vmatpush1.bf16.msra.mxu0 %v610_v17  ;;  %635 = vmatpush3.bf16.msra.mxu1 %v634_v38  ;;  %v267_v17 = vlaneseq }
  0x36   :  { %612 = vmatprep.subr.bf16.mxu0 %v756_v0  ;;  %636 = vmatprep.subr.bf16.mxu1 %v756_v0 }
  0x37   :  { %v268_v18 = vshrl.u32 %v267_v17, 7 }
  0x39   :  { %614 = vmatpush1.bf16.msra.mxu0 %v613_v20  ;;  %638 = vmatpush3.bf16.msra.mxu1 %v637_v41  ;;  %v879_v19 = vsub.s32 0, %v268_v18  ;;  %v274_v28 = vsub.s32 1, %v268_v18 }
  0x3a   :  { %615 = vmatprep.subr.bf16.mxu0 %v756_v0  ;;  %639 = vmatprep.subr.bf16.mxu1 %v756_v0 }
  0x3d   :  { %617 = vmatpush1.bf16.msra.mxu0 %v616_v23  ;;  %642 = vmatpush3.bf16.msk.msra.mxu1 %vm832_vm3, %v640_v44 }
  0x3e   :  { %618 = vmatprep.subr.bf16.mxu0 %v756_v0  ;;  %643 = vmatprep.subr.bf16.mxu1 %v756_v0 }
  0x41   :  { %620 = vmatpush1.bf16.msra.mxu0 %v619_v26 }
  0x42   :  { %621 = vmatprep.subr.bf16.mxu0 %v756_v0 }
  0x45   :  { %623 = vmatpush1.bf16.msra.mxu0 %v622_v29  ;;  %v49_v29 = vld [vmem:[%s910_s4] sm:$0xff] }
  0x46   :  { %624 = vmatprep.subr.bf16.mxu0 %v756_v0  ;;  %v285_v34 = vrot.slane %v49_v29, %v274_v28  ;;  %v422_v43 = vrot.slane %v49_v29, 4 }
  0x49   :  { %626 = vmatpush1.bf16.msra.mxu0 %v625_v32  ;;  %v280_v32 = vrot.slane %v49_v29, %v879_v19 }
  0x4a   :  { %595 = vmatprep.subr.mxu0 %v759_v46 }
  0x4c   :  { %148 = vmatmul.mubr.f32.vlgmr.msra.gmra.mrb[0].mxu0 %v517_v9  ;;  %v293_v9 = vld [vmem:[%s909_s3 + $0x28] sm:$0xff] }
  0x4d   :  { %597 = vmatprep.mubr.msk.f32.mxu0 %vm758_vm4, %v759_v46  ;;  %v650_v10 = vpack.c.bf16 %v293_v9, %v292_v8  ;;  %596 = vmatpush3.msk.msra.mxu0 %vm427_vm9, %v422_v43 }
 0x11f   :  { %v149_v47 = vpop.f32.mrb[0].mxu0 }
 0x120   :  { %v154_v48 = vsel %vm153_vm5, %v149_v47, 0.0  ;;  %v161_v49 = vmul.f32 %v149_v47, %v149_v47  ;;  %v151_v50 = vpop.f32.mrb[1].mxu0 }
 0x121   :  { %v155_v51 = vrot.slane %v154_v48, 4 }
 0x122   :  { %v162_v52 = vsel %vm153_vm5, %v161_v49, 0.0 }
 0x123   :  { %v156_v53 = vadd.f32 %v155_v51, %v154_v48  ;;  %v163_v54 = vrot.slane %v162_v52, 4 }
 0x125   :  { %v157_v55 = vrot.slane %v156_v53, 2  ;;  %v164_v56 = vadd.f32 %v163_v54, %v162_v52 }
 0x127   :  { %v158_v57 = vadd.f32 %v157_v55, %v156_v53  ;;  %v165_v58 = vrot.slane %v164_v56, 2 }
 0x129   :  { %v159_v59 = vrot.slane %v158_v57, 1  ;;  %v166_v60 = vadd.f32 %v165_v58, %v164_v56 }
 0x12b   :  { %v167_v61 = vrot.slane %v166_v60, 1  ;;  %v160_v62 = vadd.f32 %v159_v59, %v158_v57  ;;  %v407_v57 = vrot.slane %v49_v29, 2  ;;  %v412_v59 = vrot.slane %v49_v29, 3 }
 0x12d   :  { %v168_v63 = vadd.f32 %v167_v61, %v166_v60 }
 0x12f   :  { %v170_v1 = vsel %vm169_vm6, %v160_v62, %v168_v63 }
 0x130   :  { %570 = vmatmul.mubr.msk.f32.vlgmr.msra.gmra.mrb[0].mxu1 %vm181_vm7, %v170_v1 }
 0x131   :  { %592 = vmatprep.mubr.msk.f32.mxu1 %vm758_vm4, %v759_v46  ;;  %645 = vmatpush3.bf16.msra.mxu1 %v644_v4 }
 0x132   :  { %646 = vmatprep.subr.bf16.mxu1 %v756_v0 }
 0x135   :  { %648 = vmatpush3.bf16.msra.mxu1 %v647_v7 }
 0x136   :  { %649 = vmatprep.subr.bf16.mxu1 %v756_v0 }
 0x139   :  { %651 = vmatpush3.bf16.msra.mxu1 %v650_v10 }
 0x13a   :  { %652 = vmatprep.subr.bf16.mxu1 %v756_v0 }
 0x13d   :  { %654 = vmatpush3.bf16.msra.mxu1 %v653_v13  ;;  %v421_v13 = vrot.slane %v50_v12, %v879_v19 }
 0x13e   :  { %655 = vmatprep.subr.bf16.mxu1 %v756_v0 }
 0x141   :  { %658 = vmatpush3.bf16.msk.msra.mxu1 %vm832_vm3, %v656_v16 }
 0x203   :  { %v255_v20 = vpop.f32.mrb[0].mxu1 }
 0x204   :  { %v259_v21 = vmul.f32 0.02, %v255_v20  ;;  %v571_v22 = vpop.f32.mrb[1].mxu1 }
 0x206   :  { %v260_v0 = vmul.f32 %v259_v21, %v259_v21  ;;  %v270_v23 = vrot.slane %v259_v21, %v879_v19 }
 0x208   :  { %v262_v24 = vrot.slane %v260_v0, 7  ;;  %v271_v25 = vsub.f32 %v149_v47, %v270_v23 }
 0x20a   :  { %v264_v26 = vsub.f32 %v259_v21, %v262_v24 }
 0x20c   :  { %v265_v27 = vadd.f32 1e-05, %v264_v26 }
 0x20e   :  { %676 = vrsqrt.f32 %v265_v27 }
 0x218   :  { %v677_v30 = vpop.eup %676 }
 0x219   :  { %v275_v31 = vrot.slane %v677_v30, %v274_v28 }
 0x21b   :  { %v276_v33 = vmul.f32 %v275_v31, %v271_v25 }
 0x21d   :  { %v281_v35 = vmul.f32 %v280_v32, %v276_v33 }
 0x21f   :  { %v286_v36 = vadd.f32 %v285_v34, %v281_v35 }
 0x221   :  { %v287_v37 = vmax.f32 %v286_v36, 0.0 }
 0x223   :  { %593 = vmatmul.mubr.msk.f32.vlgmr.msra.gmra.mrb[2].mxu1 %vm181_vm7, %v287_v37 }
 0x2f6   :  { %v370_v38 = vpop.f32.mrb[2].mxu1 }
 0x2f7   :  { %v594_v39 = vpop.f32.mrb[3].mxu1  ;;  %v375_v40 = vsel %vm374_vm8, %v370_v38, 0.0  ;;  %v387_v41 = vmul.f32 %v370_v38, %v370_v38 }
 0x2f8   :  { %376 = vadd.xlane.f32.xlu0 %v375_v40 }
 0x2f9   :  { %v388_v42 = vsel %vm374_vm8, %v387_v41, 0.0 }
 0x2fc   :  { %389 = vadd.xlane.f32.xlu0 %v388_v42 }
 0x385   :  { %v377_v44 = vpop.xlane.xlu0 %376 }
 0x386   :  { %v378_v45 = vrot.slane %v377_v44, 4 }
 0x388   :  { %v379_v46 = vadd.f32 %v378_v45, %v377_v44 }
 0x389   :  { %v390_v47 = vpop.xlane.xlu0 %389 }
 0x38a   :  { %v380_v48 = vrot.slane %v379_v46, 2  ;;  %v391_v49 = vrot.slane %v390_v47, 4 }
 0x38c   :  { %v392_v50 = vadd.f32 %v391_v49, %v390_v47  ;;  %v381_v51 = vadd.f32 %v380_v48, %v379_v46 }
 0x38e   :  { %v393_v52 = vrot.slane %v392_v50, 2  ;;  %v382_v53 = vrot.slane %v381_v51, 1 }
 0x390   :  { %v394_v54 = vadd.f32 %v393_v52, %v392_v50  ;;  %v383_v55 = vadd.f32 %v382_v53, %v381_v51 }
 0x392   :  { %659 = vpush %v383_v55  ;;  %v395_v56 = vrot.slane %v394_v54, 1 }
 0x394   :  { %v396_v58 = vadd.f32 %v395_v56, %v394_v54 }
 0x396   :  { %661 = vpush %v396_v58 }
 0x397   :  { %663 = vpush %v407_v57 }
 0x398   :  { %665 = vpush %v412_v59 }
 0x3c3   :  { %s660_s14 = spop %659 }
 0x3c4   :  { %v385_v60 = vstv %s660_s14 }
 0x3c5   :  { %v386_v61 = vmul.f32 0.125, %v385_v60 }
 0x3c7   :  { %s662_s15 = spop %661  ;;  %v400_v63 = vmul.f32 %v386_v61, %v386_v61  ;;  %v404_v4 = vsub.f32 %v370_v38, %v386_v61 }
 0x3c8   :  { %v398_v62 = vstv %s662_s15  ;;  %s664_s16 = spop %663 }
 0x3c9   :  { %v399_v1 = vmul.f32 0.125, %v398_v62  ;;  %s666_s1 = spop %665  ;;  %v409_v6 = vstv %s664_s16 }
 0x3ca   :  { %v414_v8 = vstv %s666_s1 }
 0x3cb   :  { %v401_v2 = vsub.f32 %v399_v1, %v400_v63 }
 0x3cd   :  { %v402_v3 = vadd.f32 1e-05, %v401_v2 }
 0x3cf   :  { %678 = vrsqrt.f32 %v402_v3 }
 0x3d9   :  { %v679_v5 = vpop.eup %678 }
 0x3da   :  { %v405_v7 = vmul.f32 %v679_v5, %v404_v4 }
 0x3dc   :  { %v411_v9 = vmul.f32 %v409_v6, %v405_v7 }
 0x3de   :  { %v416_v10 = vadd.f32 %v414_v8, %v411_v9 }
 0x3e0   :  { %v417_v11 = vmax.f32 %v416_v10, 0.0 }
 0x3e2   :  { %598 = vmatmul.mubr.msk.f32.vlgmr.msra.gmra.mrb[2].mxu0 %vm423_vm10, %v417_v11 }
 0x4b5   :  { %v496_v14 = vpop.f32.mrb[2].mxu0 }
 0x4b6   :  { %v497_v15 = vadd.f32 %v496_v14, %v421_v13  ;;  %v599_v16 = vpop.f32.mrb[3].mxu0 }
 0x4b8   :  { %500 = vst.msk [vmem:[#allocation7] sm:$0x3] %vm374_vm8, %v497_v15 }
 0x4b9   :  { %735 = shalt.err (!%p732_p6)
}
 0x4ba   :  { %s736_s4 = scalar_lea.hbm %s911_s5, 32 }
 0x4bb   :  { %p737_p7 = scmp.ne.s32.totalorder %s911_s5, %s736_s4  ;;  %p740_p8 = scmp.lt.u32.totalorder %s736_s4, %s911_s5 }
 0x4bd   :  { %p742_p9 = pnand %p740_p8, %p737_p7 }
 0x4bf   :  { %745 = shalt.err (!%p742_p9)
}
 0x4c0   :  { %510 = dma.vmem_to_hbm [thread:$0]  %s508_s0, 32, %s911_s5, [#allocation4]  }
 0x4c1   :  { %750 = dma.done.wait [#allocation4], 32  }
 0x4c2   :  { %751 = vsyncadd [#allocation4], 4294967264 }
 0x4c3   :  { %514 = vsyncpa [#allocation3], 1 }
 0x4c4   :  { %515 = vsyncpa [#allocation6], 1 }
 0x4c5   :  { %516 = vsyncpa [#allocation4], 1 }

</bundles_post_ra>
